<compile_context>
chip_gen: v6e
topology: v6e:2x2x1
jax: 0.10.0
libtpu: 0.0.40
codegen_flags: <defaults>
</compile_context>

<pallas_src>
import functools

import jax
import jax.numpy as jnp
from jax.experimental import pallas as pl
from jax.experimental.pallas import tpu as pltpu

HIDDEN1 = 512
HIDDEN2 = 256
LANE = 128      # TPU lane width; the action dim is padded to a multiple of this.
SUBLANE = 8     # minimum sublane granularity for the batch (row) axis.


def actor_kernel(obs_ref, w1_ref, b1_ref, w2_ref, b2_ref, w3_ref, b3_ref,
                 out_ref):
    # obs_ref: (TB, D_obs) f32; weights bf16; biases f32; out (TB, A_pad).
    # bf16 cast happens here on the VPU (free slack) instead of a wrapper XLA op.
    x = obs_ref[...].astype(jnp.bfloat16)

    # Layer 1: Linear + ReLU  (MXU matmul with bf16 inputs, f32 accumulate)
    h1 = jnp.dot(x, w1_ref[...], preferred_element_type=jnp.float32)
    h1 = jnp.maximum(h1 + b1_ref[...], 0.0).astype(jnp.bfloat16)      # (TB, 512)

    # Layer 2: Linear + ReLU
    h2 = jnp.dot(h1, w2_ref[...], preferred_element_type=jnp.float32)
    h2 = jnp.maximum(h2 + b2_ref[...], 0.0).astype(jnp.bfloat16)      # (TB, 256)

    # Layer 3: Linear + Tanh (tanh -> EUP; output lane-dense, multiple of 128)
    h3 = jnp.dot(h2, w3_ref[...], preferred_element_type=jnp.float32)
    out_ref[...] = jnp.tanh(h3 + b3_ref[...]).astype(out_ref.dtype)   # (TB, A_pad)


@functools.partial(jax.jit,
                   static_argnames=("dim_action", "batch_tile", "out_dtype"))
def actor_forward(obs, prepared, *, dim_action, batch_tile=512,
                  out_dtype=jnp.float32):
    """obs: (B, dim_observation) f32; prepared: output of prepare_actor_params."""
    w1, b1 = prepared["w1"], prepared["b1"]
    w2, b2 = prepared["w2"], prepared["b2"]
    w3, b3 = prepared["w3"], prepared["b3"]

    B, dim_obs = obs.shape
    A_pad = w3.shape[1]  # already lane-dense (multiple of 128) from prepare step

    # --- batch tiling -------------------------------------------------------
    if B < 2 * 256:
        # Small-batch fast path (per-agent action selection): one tile, padded
        # only up to the 8-sublane minimum instead of a full 128/512-row tile.
        tile = max(SUBLANE, pl.cdiv(B, SUBLANE) * SUBLANE)
        num_tiles = 1
    else:
        # Keep M >= 256 (fills the 256-wide MXU on v6e/v7x) and >= 2 grid steps
        # so the "parallel" axis shards across both v7x TensorCores.
        half = pl.cdiv(pl.cdiv(B, 2), 256) * 256
        tile = min(batch_tile, half)
        num_tiles = pl.cdiv(B, tile)

    B_pad = num_tiles * tile
    if B_pad != B:
        obs = jnp.pad(obs, ((0, B_pad - B), (0, 0)))

    # Weights/biases: full block, index_map pinned to block (0, 0) so they stay
    # VMEM-resident across the batch grid (no per-tile re-DMA).
    resident = lambda shape: pl.BlockSpec(shape, lambda i: (0, 0))

    out_padded = pl.pallas_call(
        actor_kernel,
        out_shape=jax.ShapeDtypeStruct((B_pad, A_pad), out_dtype),
        grid=(num_tiles,),
        in_specs=[
            pl.BlockSpec((tile, dim_obs), lambda i: (i, 0)),
            resident(w1.shape), resident(b1.shape),
            resident(w2.shape), resident(b2.shape),
            resident(w3.shape), resident(b3.shape),
        ],
        out_specs=pl.BlockSpec((tile, A_pad), lambda i: (i, 0)),
        compiler_params=pltpu.CompilerParams(
            dimension_semantics=("parallel",)),
    )(obs, w1, b1, w2, b2, w3, b3)

    return out_padded[:B, :dim_action]


def init_actor_params(key, dim_observation, dim_action):
    """Deterministic f32 init mimicking PyTorch nn.Linear default (U[-1/sqrt(fan_in), +])."""
    def linear(key, fan_in, fan_out):
        kw, kb = jax.random.split(key)
        bound = 1.0 / jnp.sqrt(float(fan_in))
        # stored as (in, out) so the kernel computes x @ W + b
        w = jax.random.uniform(kw, (fan_in, fan_out), jnp.float32, -bound, bound)
        b = jax.random.uniform(kb, (1, fan_out), jnp.float32, -bound, bound)
        return w, b

    k1, k2, k3 = jax.random.split(key, 3)
    w1, b1 = linear(k1, dim_observation, HIDDEN1)
    w2, b2 = linear(k2, HIDDEN1, HIDDEN2)
    w3, b3 = linear(k3, HIDDEN2, dim_action)
    return {"w1": w1, "b1": b1, "w2": w2, "b2": b2, "w3": w3, "b3": b3}


def prepare_actor_params(params):
    """One-time prep (hoisted out of the per-call jitted path):
      * cast weights to bf16 for the MXU (biases stay f32 for the VPU adds),
      * zero-pad layer-3 weight/bias columns to a lane-dense multiple of 128
        (padded columns produce tanh(0)=0 and are sliced off in the wrapper).
    """
    w3, b3 = params["w3"], params["b3"]
    dim_action = w3.shape[1]
    A_pad = max(LANE, pl.cdiv(dim_action, LANE) * LANE)
    if A_pad != dim_action:
        w3 = jnp.pad(w3, ((0, 0), (0, A_pad - dim_action)))
        b3 = jnp.pad(b3, ((0, 0), (0, A_pad - dim_action)))
    return {
        "w1": params["w1"].astype(jnp.bfloat16), "b1": params["b1"],
        "w2": params["w2"].astype(jnp.bfloat16), "b2": params["b2"],
        "w3": w3.astype(jnp.bfloat16), "b3": b3,
    }


def actor_reference(obs, params):
    """Plain-JAX f32 reference for correctness check."""
    h = jnp.maximum(obs @ params["w1"] + params["b1"], 0.0)
    h = jnp.maximum(h @ params["w2"] + params["b2"], 0.0)
    return jnp.tanh(h @ params["w3"] + params["b3"])


if __name__ == "__main__":
    key = jax.random.PRNGKey(0)
    k_params, k_obs = jax.random.split(key)

    batch = 8
    dim_observation = 16
    dim_action = 8

    params = init_actor_params(k_params, dim_observation, dim_action)
    prepared = jax.tree_util.tree_map(jax.block_until_ready,
                                      prepare_actor_params(params))
    obs = jax.random.normal(k_obs, (batch, dim_observation), jnp.float32)

    out = actor_forward(obs, prepared, dim_action=dim_action)
    out = jax.block_until_ready(out)

    ref = actor_reference(obs, params)
    assert out.shape == (batch, dim_action), out.shape
    # bf16 matmul inputs with f32 accumulation -> loosened tolerance.
    assert jnp.max(jnp.abs(out - ref)) < 2e-2, "mismatch vs reference"

    print("KERNEL_OK")
</pallas_src>

<mosaic_0001>
module attributes {stable_mosaic.version = 11 : i64} {
  func.func @actor_kernel(%arg0: i32, %arg1: memref<8x16xf32, #tpu.memory_space<vmem>>, %arg2: memref<16x512xbf16, #tpu.memory_space<vmem>>, %arg3: memref<1x512xf32, #tpu.memory_space<vmem>>, %arg4: memref<512x256xbf16, #tpu.memory_space<vmem>>, %arg5: memref<1x256xf32, #tpu.memory_space<vmem>>, %arg6: memref<256x128xbf16, #tpu.memory_space<vmem>>, %arg7: memref<1x128xf32, #tpu.memory_space<vmem>>, %arg8: memref<8x128xf32, #tpu.memory_space<vmem>>) attributes {dimension_semantics = [#tpu.dimension_semantics<parallel>], iteration_bounds = array<i64: 1>, scalar_prefetch = 0 : i64, scratch_operands = 0 : i64, tpu.core_type = #tpu.core_type<tc>, window_params = [{transform_indices = @transform_0, window_bounds = array<i64: 8, 16>}, {pipeline_mode = #tpu.pipeline_mode<synchronous>, transform_indices = @transform_1, window_bounds = array<i64: 16, 512>}, {pipeline_mode = #tpu.pipeline_mode<synchronous>, transform_indices = @transform_2, window_bounds = array<i64: 1, 512>}, {pipeline_mode = #tpu.pipeline_mode<synchronous>, transform_indices = @transform_3, window_bounds = array<i64: 512, 256>}, {pipeline_mode = #tpu.pipeline_mode<synchronous>, transform_indices = @transform_4, window_bounds = array<i64: 1, 256>}, {pipeline_mode = #tpu.pipeline_mode<synchronous>, transform_indices = @transform_5, window_bounds = array<i64: 256, 128>}, {pipeline_mode = #tpu.pipeline_mode<synchronous>, transform_indices = @transform_6, window_bounds = array<i64: 1, 128>}, {transform_indices = @transform_7, window_bounds = array<i64: 8, 128>}]} {
    %c0 = arith.constant 0 : index
    %c0_0 = arith.constant 0 : index
    %0 = vector.load %arg1[%c0, %c0_0] : memref<8x16xf32, #tpu.memory_space<vmem>>, vector<8x16xf32>
    %1 = arith.truncf %0 : vector<8x16xf32> to vector<8x16xbf16>
    %c0_1 = arith.constant 0 : index
    %c0_2 = arith.constant 0 : index
    %2 = vector.load %arg2[%c0_1, %c0_2] : memref<16x512xbf16, #tpu.memory_space<vmem>>, vector<16x512xbf16>
    %cst = arith.constant dense<0.000000e+00> : vector<8x512xf32>
    %3 = tpu.matmul %1, %2, %cst {dimension_numbers = #tpu.dot_dimension_numbers<[1], [0], [0], [1], [0, 0, 1, 1], [], []>} : vector<8x16xbf16>, vector<16x512xbf16>, vector<8x512xf32> -> vector<8x512xf32>
    %c0_3 = arith.constant 0 : index
    %c0_4 = arith.constant 0 : index
    %4 = vector.load %arg3[%c0_3, %c0_4] : memref<1x512xf32, #tpu.memory_space<vmem>>, vector<1x512xf32>
    %5 = vector.broadcast %4 : vector<1x512xf32> to vector<8x512xf32>
    %6 = arith.addf %3, %5 : vector<8x512xf32>
    %cst_5 = arith.constant 0.000000e+00 : f32
    %7 = vector.broadcast %cst_5 : f32 to vector<8x512xf32>
    %8 = arith.maximumf %6, %7 : vector<8x512xf32>
    %9 = arith.truncf %8 : vector<8x512xf32> to vector<8x512xbf16>
    %c0_6 = arith.constant 0 : index
    %c0_7 = arith.constant 0 : index
    %10 = vector.load %arg4[%c0_6, %c0_7] : memref<512x256xbf16, #tpu.memory_space<vmem>>, vector<512x256xbf16>
    %cst_8 = arith.constant dense<0.000000e+00> : vector<8x256xf32>
    %11 = tpu.matmul %9, %10, %cst_8 {dimension_numbers = #tpu.dot_dimension_numbers<[1], [0], [0], [1], [0, 0, 1, 1], [], []>} : vector<8x512xbf16>, vector<512x256xbf16>, vector<8x256xf32> -> vector<8x256xf32>
    %c0_9 = arith.constant 0 : index
    %c0_10 = arith.constant 0 : index
    %12 = vector.load %arg5[%c0_9, %c0_10] : memref<1x256xf32, #tpu.memory_space<vmem>>, vector<1x256xf32>
    %13 = vector.broadcast %12 : vector<1x256xf32> to vector<8x256xf32>
    %14 = arith.addf %11, %13 : vector<8x256xf32>
    %cst_11 = arith.constant 0.000000e+00 : f32
    %15 = vector.broadcast %cst_11 : f32 to vector<8x256xf32>
    %16 = arith.maximumf %14, %15 : vector<8x256xf32>
    %17 = arith.truncf %16 : vector<8x256xf32> to vector<8x256xbf16>
    %c0_12 = arith.constant 0 : index
    %c0_13 = arith.constant 0 : index
    %18 = vector.load %arg6[%c0_12, %c0_13] : memref<256x128xbf16, #tpu.memory_space<vmem>>, vector<256x128xbf16>
    %cst_14 = arith.constant dense<0.000000e+00> : vector<8x128xf32>
    %19 = tpu.matmul %17, %18, %cst_14 {dimension_numbers = #tpu.dot_dimension_numbers<[1], [0], [0], [1], [0, 0, 1, 1], [], []>} : vector<8x256xbf16>, vector<256x128xbf16>, vector<8x128xf32> -> vector<8x128xf32>
    %c0_15 = arith.constant 0 : index
    %c0_16 = arith.constant 0 : index
    %20 = vector.load %arg7[%c0_15, %c0_16] : memref<1x128xf32, #tpu.memory_space<vmem>>, vector<1x128xf32>
    %21 = vector.broadcast %20 : vector<1x128xf32> to vector<8x128xf32>
    %22 = arith.addf %19, %21 : vector<8x128xf32>
    %23 = math.tanh %22 : vector<8x128xf32>
    %c0_17 = arith.constant 0 : index
    %c0_18 = arith.constant 0 : index
    %24 = vector.load %arg8[%c0_17, %c0_18] : memref<8x128xf32, #tpu.memory_space<vmem>>, vector<8x128xf32>
    tpu.vector_store %arg8[%c0_17, %c0_18], %23 {strides = array<i32>} : memref<8x128xf32, #tpu.memory_space<vmem>>, vector<8x128xf32>,
    return
  }
  func.func @transform_0(%arg0: i32) -> (i32, i32) {
    %c0_i32 = arith.constant 0 : i32
    %c0_i32_0 = arith.constant 0 : i32
    return %arg0, %c0_i32 : i32, i32
  }
  func.func @transform_1(%arg0: i32) -> (i32, i32) {
    %c0_i32 = arith.constant 0 : i32
    %c0_i32_0 = arith.constant 0 : i32
    %c0_i32_1 = arith.constant 0 : i32
    return %c0_i32, %c0_i32_0 : i32, i32
  }
  func.func @transform_2(%arg0: i32) -> (i32, i32) {
    %c0_i32 = arith.constant 0 : i32
    %c0_i32_0 = arith.constant 0 : i32
    %c0_i32_1 = arith.constant 0 : i32
    return %c0_i32, %c0_i32_0 : i32, i32
  }
  func.func @transform_3(%arg0: i32) -> (i32, i32) {
    %c0_i32 = arith.constant 0 : i32
    %c0_i32_0 = arith.constant 0 : i32
    %c0_i32_1 = arith.constant 0 : i32
    return %c0_i32, %c0_i32_0 : i32, i32
  }
  func.func @transform_4(%arg0: i32) -> (i32, i32) {
    %c0_i32 = arith.constant 0 : i32
    %c0_i32_0 = arith.constant 0 : i32
    %c0_i32_1 = arith.constant 0 : i32
    return %c0_i32, %c0_i32_0 : i32, i32
  }
  func.func @transform_5(%arg0: i32) -> (i32, i32) {
    %c0_i32 = arith.constant 0 : i32
    %c0_i32_0 = arith.constant 0 : i32
    %c0_i32_1 = arith.constant 0 : i32
    return %c0_i32, %c0_i32_0 : i32, i32
  }
  func.func @transform_6(%arg0: i32) -> (i32, i32) {
    %c0_i32 = arith.constant 0 : i32
    %c0_i32_0 = arith.constant 0 : i32
    %c0_i32_1 = arith.constant 0 : i32
    return %c0_i32, %c0_i32_0 : i32, i32
  }
  func.func @transform_7(%arg0: i32) -> (i32, i32) {
    %c0_i32 = arith.constant 0 : i32
    %c0_i32_0 = arith.constant 0 : i32
    return %arg0, %c0_i32 : i32, i32
  }
}

</mosaic_0001>

<bundles_post_ra>
// kernel: actor_forward.1
= control target key start
LH: loop header
LB: loop body
LE: loop exit
PB: predicated region body
PF: predicated region fallthrough
CT: control target
= control target key end

     0   :  { %12 = vsyncpa [#allocation3], 0  ;;  %s1373_s0 = inlined_call_operand.hbm [shape: f32[8,16], index: 0, kind: input, shape index: {}]   ;;  %s1374_s1 = inlined_call_operand.hbm [shape: bf16[16,512], index: 1, kind: input, shape index: {}]   ;;  %s1375_s2 = inlined_call_operand.hbm [shape: f32[1,512], index: 2, kind: input, shape index: {}]   ;;  %s1376_s3 = inlined_call_operand.hbm [shape: bf16[512,256], index: 3, kind: input, shape index: {}]   ;;  %s1377_s4 = inlined_call_operand.vmem [shape: f32[1,256], index: 4, kind: input, shape index: {}]   ;;  %s1378_s5 = inlined_call_operand.hbm [shape: bf16[256,128], index: 5, kind: input, shape index: {}]   ;;  %s1379_s6 = inlined_call_operand.vmem [shape: f32[1,128], index: 6, kind: input, shape index: {}]   ;;  %s1380_s7 = inlined_call_operand.hbm [shape: f32[8,128], index: 7, kind: output, shape index: {}]  }
   0x1   :  { %13 = vsyncpa [#allocation6], 0 }
   0x2   :  { %14 = vsyncpa [#allocation9], 0 }
   0x3   :  { %15 = vsyncpa [#allocation4], 0  ;;  %s1280_s24 = smov [#allocation5]  }
   0x4   :  { %s31_s25 = sshll.u32 %s1280_s24, 4  ;;  %s32_s25 = int_to_ptr.vmem [resolvable:$true] %s31_s25 }
   0x5   :  { %s1160_s26 = scalar_lea.vmem %s32_s25, 512  ;;  %p1165_p1 = scmp.lt.s32.totalorder %s32_s25, %s32_s25 }
   0x6   :  { %p1161_p0 = scmp.ne.s32.totalorder %s32_s25, %s1160_s26  ;;  %p1166_p2 = scmp.lt.s32.totalorder %s1160_s26, %s1160_s26 }
   0x8   :  { %p1167_p3 = por %p1166_p2, %p1165_p1 }
   0xa   :  { %p1168_p4 = pnand %p1167_p3, %p1161_p0 }
   0xc   :  { %1171 = shalt.err (!%p1168_p4)
}
   0xd   :  { %s1281_s27 = smov 256   ;;  %s1282_s28 = smov 16  }
   0xe   :  { %37 = dma.hbm_to_vmem [thread:$0]  %s1374_s1, 512, %s32_s25, [#allocation6], %s1281_s27, %s1281_s27, %s1282_s28  }
   0xf   :  { %s1283_s8 = smov [#allocation8]  }
  0x10   :  { %s53_s9 = sshll.u32 %s1283_s8, 4  ;;  %s54_s9 = int_to_ptr.vmem [resolvable:$true] %s53_s9 }
  0x11   :  { %s1180_s10 = scalar_lea.vmem %s54_s9, 8192  ;;  %p1185_p6 = scmp.lt.s32.totalorder %s54_s9, %s54_s9 }
  0x12   :  { %p1181_p5 = scmp.ne.s32.totalorder %s54_s9, %s1180_s10  ;;  %p1186_p7 = scmp.lt.s32.totalorder %s1180_s10, %s1180_s10 }
  0x14   :  { %p1187_p8 = por %p1186_p7, %p1185_p6 }
  0x16   :  { %p1188_p9 = pnand %p1187_p8, %p1181_p5 }
  0x18   :  { %1191 = shalt.err (!%p1188_p9)
}
  0x19   :  { %s1284_s11 = smov 128   ;;  %s1285_s12 = smov 8  }
  0x1a   :  { %59 = dma.hbm_to_vmem [thread:$0]  %s1376_s3, 8192, %s54_s9, [#allocation9], %s1284_s11, %s1284_s11, %s1285_s12  }
  0x1b   :  { %s1286_s15 = smov [#allocation2]   ;;  %s1287_s17 = smov [#allocation7]  }
  0x1c   :  { %s22_s16 = sshll.u32 %s1286_s15, 4  ;;  %s44_s1 = sshll.u32 %s1287_s17, 4  ;;  %s23_s16 = int_to_ptr.vmem [resolvable:$true] %s22_s16  ;;  %s45_s1 = int_to_ptr.vmem [resolvable:$true] %s44_s1 }
  0x1d   :  { %s1200_s18 = scalar_lea.vmem %s23_s16, 128  ;;  %p1205_p11 = scmp.lt.s32.totalorder %s23_s16, %s23_s16 }
  0x1e   :  { %p1201_p10 = scmp.ne.s32.totalorder %s23_s16, %s1200_s18  ;;  %p1206_p12 = scmp.lt.s32.totalorder %s1200_s18, %s1200_s18 }
  0x20   :  { %p1207_p13 = por %p1206_p12, %p1205_p11 }
  0x22   :  { %p1208_p0 = pnand %p1207_p13, %p1201_p10 }
  0x24   :  { %1211 = shalt.err (!%p1208_p0)
}
  0x25   :  { %25 = dma.hbm_to_vmem [thread:$0]  %s1373_s0, 128, %s23_s16, [#allocation3]  }
  0x26   :  { %s1220_s21 = scalar_lea.vmem %s45_s1, 64  ;;  %p1225_p2 = scmp.lt.s32.totalorder %s45_s1, %s45_s1 }
  0x27   :  { %p1221_p1 = scmp.ne.s32.totalorder %s45_s1, %s1220_s21  ;;  %p1226_p3 = scmp.lt.s32.totalorder %s1220_s21, %s1220_s21 }
  0x29   :  { %p1227_p4 = por %p1226_p3, %p1225_p2 }
  0x2b   :  { %p1228_p5 = pnand %p1227_p4, %p1221_p1 }
  0x2d   :  { %1231 = shalt.err (!%p1228_p5)
}
  0x2e   :  { %47 = dma.hbm_to_vmem [thread:$0]  %s1375_s2, 64, %s45_s1, [#allocation6]  }
  0x2f   :  { %s1288_s23 = smov [#allocation10]  }
  0x30   :  { %s67_s24 = sshll.u32 %s1288_s23, 4  ;;  %s68_s24 = int_to_ptr.vmem [resolvable:$true] %s67_s24 }
  0x31   :  { %s1240_s25 = scalar_lea.vmem %s68_s24, 2048  ;;  %p1245_p7 = scmp.lt.s32.totalorder %s68_s24, %s68_s24 }
  0x32   :  { %p1241_p6 = scmp.ne.s32.totalorder %s68_s24, %s1240_s25  ;;  %p1246_p8 = scmp.lt.s32.totalorder %s1240_s25, %s1240_s25 }
  0x34   :  { %p1247_p9 = por %p1246_p8, %p1245_p7 }
  0x36   :  { %p1248_p10 = pnand %p1247_p9, %p1241_p6 }
  0x38   :  { %1251 = shalt.err (!%p1248_p10)
}
  0x39   :  { %s1289_s0 = smov 64   ;;  %s1290_s26 = smov 4  }
  0x3a   :  { %73 = dma.hbm_to_vmem [thread:$0]  %s1378_s5, 2048, %s68_s24, [#allocation9], %s1289_s0, %s1289_s0, %s1290_s26  }
  0x3b   :  { %1272 = dma.done.wait [#allocation3], 128  }
  0x3c   :  { %1273 = vsyncadd [#allocation3], 4294967168 }
  0x3d   :  { %1274 = dma.done.wait [#allocation6], 576  }
  0x3e   :  { %1275 = vsyncadd [#allocation6], 4294966720 }
  0x3f   :  { %1276 = dma.done.wait [#allocation9], 10240  }
  0x40   :  { %1277 = vsyncadd [#allocation9], 4294957056  ;;  %v1291_v0 = vmov 0   ;;  %v1032_v1 = vld [vmem:[#allocation5 + $0x4] ss:$16 sps:$4 sm:$0xff]   ;;  %v92_v3 = vld [vmem:[#allocation2] sm:$0xff] }
  0x41   :  { %176 = vmatprep.mubr.bf16.mxu1 %v1291_v0  ;;  %v1034_v2 = vld [vmem:[#allocation5] ss:$16 sps:$4 sm:$0xff]   ;;  %158 = vmatprep.subr.bf16.mxu1 %v1032_v1  ;;  %v93_v4 = vpack.c.bf16 %v92_v3, %v92_v3  ;;  %v1035_v5 = vld [vmem:[#allocation5 + $0x8] ss:$16 sps:$4 sm:$0xff]   ;;  %v1037_v6 = vld [vmem:[#allocation5 + $0xc] ss:$16 sps:$4 sm:$0xff]  }
  0x42   :  { %159 = vmatpush1.bf16.msra.mxu1 %v1034_v2  ;;  %vm140_vm0 = vcmask 130048   ;;  %v1038_v7 = vld [vmem:[#allocation8 + $0x74] ss:$8 sps:$4 sm:$0xff]   ;;  %v1040_v8 = vld [vmem:[#allocation8 + $0x70] ss:$8 sps:$4 sm:$0xff]   ;;  %s1292_s30 = smov [#allocation11]  }
  0x43   :  { %199 = vmatprep.subr.bf16.mxu1 %v1037_v6  ;;  %630 = vmatprep.subr.bf16.mxu0 %v1038_v7  ;;  %v1041_v9 = vld [vmem:[#allocation8 + $0x64] ss:$8 sps:$4 sm:$0xff]   ;;  %v1043_v10 = vld [vmem:[#allocation8 + $0x60] ss:$8 sps:$4 sm:$0xff]   ;;  %v1044_v11 = vld [vmem:[#allocation8 + $0x54] ss:$8 sps:$4 sm:$0xff]  }
  0x44   :  { %631 = vmatpush1.bf16.msra.mxu0 %v1040_v8  ;;  %v1048_v12 = vld [vmem:[#allocation8 + $0x174] ss:$8 sps:$4 sm:$0xff]   ;;  %v1046_v13 = vld [vmem:[#allocation8 + $0x170] ss:$8 sps:$4 sm:$0xff]   ;;  %v1050_v15 = vld [vmem:[#allocation8 + $0x44] ss:$8 sps:$4 sm:$0xff]   ;;  %v100_v8 = vlaneseq }
  0x45   :  { %914 = vmatmul.mubr.msk.bf16.vlgmr.msra.gmra.mxu1 %vm140_vm0, %v93_v4  ;;  %632 = vmatprep.subr.bf16.mxu0 %v1041_v9  ;;  %v1049_v14 = vld [vmem:[#allocation8 + $0x50] ss:$8 sps:$4 sm:$0xff]   ;;  %v1054_v16 = vld [vmem:[#allocation8 + $0x164] ss:$8 sps:$4 sm:$0xff]   ;;  %v1055_v17 = vld [vmem:[#allocation8 + $0x40] ss:$8 sps:$4 sm:$0xff]  }
  0x46   :  { %200 = vmatpush1.bf16.msra.mxu1 %v1035_v5  ;;  %217 = vmatprep.mubr.bf16.mxu1 %v1291_v0  ;;  %v1052_v18 = vld [vmem:[#allocation8 + $0x160] ss:$8 sps:$4 sm:$0xff]   ;;  %v1056_v19 = vld [vmem:[#allocation8 + $0x34] ss:$8 sps:$4 sm:$0xff]   ;;  %v1058_v21 = vld [vmem:[#allocation8 + $0x150] ss:$8 sps:$4 sm:$0xff]  }
  0x47   :  { %671 = vmatprep.subr.bf16.mxu1 %v1048_v12  ;;  %v1060_v20 = vld [vmem:[#allocation8 + $0x154] ss:$8 sps:$4 sm:$0xff]   ;;  %v1061_v22 = vld [vmem:[#allocation8 + $0x30] ss:$8 sps:$4 sm:$0xff]   ;;  %v1062_v23 = vld [vmem:[#allocation8 + $0x24] ss:$8 sps:$4 sm:$0xff]  }
  0x48   :  { %633 = vmatpush1.bf16.msra.mxu0 %v1043_v10  ;;  %v1066_v24 = vld [vmem:[#allocation8 + $0x144] ss:$8 sps:$4 sm:$0xff]   ;;  %v1067_v25 = vld [vmem:[#allocation8 + $0x20] ss:$8 sps:$4 sm:$0xff]   ;;  %v1068_v27 = vld [vmem:[#allocation8 + $0x14] ss:$8 sps:$4 sm:$0xff]  }
  0x49   :  { %634 = vmatprep.subr.bf16.mxu0 %v1044_v11  ;;  %v1064_v26 = vld [vmem:[#allocation8 + $0x140] ss:$8 sps:$4 sm:$0xff]   ;;  %v1072_v28 = vld [vmem:[#allocation8 + $0x134] ss:$8 sps:$4 sm:$0xff]   ;;  %v1070_v29 = vld [vmem:[#allocation8 + $0x130] ss:$8 sps:$4 sm:$0xff]  }
  0x4a   :  { %v1073_v30 = vld [vmem:[#allocation8 + $0x10] ss:$8 sps:$4 sm:$0xff]   ;;  %v1074_v31 = vld [vmem:[#allocation8 + $0x4] ss:$8 sps:$4 sm:$0xff]   ;;  %v1079_v33 = vld [vmem:[#allocation8] ss:$8 sps:$4 sm:$0xff]  }
  0x4b   :  { %v1078_v32 = vld [vmem:[#allocation8 + $0x124] ss:$8 sps:$4 sm:$0xff]   ;;  %v1076_v34 = vld [vmem:[#allocation8 + $0x120] ss:$8 sps:$4 sm:$0xff]   ;;  %v1080_v35 = vld [vmem:[#allocation8 + $0xf4] ss:$8 sps:$4 sm:$0xff]  }
  0x4c   :  { %635 = vmatpush1.bf16.msra.mxu0 %v1049_v14  ;;  %v1084_v36 = vld [vmem:[#allocation8 + $0x114] ss:$8 sps:$4 sm:$0xff]   ;;  %v1082_v37 = vld [vmem:[#allocation8 + $0x110] ss:$8 sps:$4 sm:$0xff]   ;;  %v1086_v39 = vld [vmem:[#allocation8 + $0xe4] ss:$8 sps:$4 sm:$0xff]  }
  0x4d   :  { %915 = vmatmul.mubr.msk.bf16.vlgmr.msra.gmra.mxu1 %vm140_vm0, %v93_v4  ;;  %636 = vmatprep.subr.bf16.mxu0 %v1050_v15  ;;  %v1085_v38 = vld [vmem:[#allocation8 + $0xf0] ss:$8 sps:$4 sm:$0xff]   ;;  %v1090_v40 = vld [vmem:[#allocation8 + $0x104] ss:$8 sps:$4 sm:$0xff]   ;;  %v1088_v41 = vld [vmem:[#allocation8 + $0x100] ss:$8 sps:$4 sm:$0xff]  }
  0x4e   :  { %672 = vmatpush1.bf16.msra.mxu1 %v1046_v13  ;;  %v1091_v42 = vld [vmem:[#allocation8 + $0xe0] ss:$8 sps:$4 sm:$0xff]   ;;  %v1092_v43 = vld [vmem:[#allocation8 + $0xd4] ss:$8 sps:$4 sm:$0xff]   ;;  %v1097_v45 = vld [vmem:[#allocation8 + $0xd0] ss:$8 sps:$4 sm:$0xff]  }
  0x4f   :  { %673 = vmatprep.subr.bf16.mxu1 %v1054_v16  ;;  %v1096_v44 = vld [vmem:[#allocation8 + $0x1f4] ss:$8 sps:$4 sm:$0xff]   ;;  %v1094_v46 = vld [vmem:[#allocation8 + $0x1f0] ss:$8 sps:$4 sm:$0xff]   ;;  %v1098_v47 = vld [vmem:[#allocation8 + $0xc4] ss:$8 sps:$4 sm:$0xff]  }
  0x50   :  { %637 = vmatpush1.bf16.msra.mxu0 %v1055_v17  ;;  %v1102_v48 = vld [vmem:[#allocation8 + $0x1e4] ss:$8 sps:$4 sm:$0xff]   ;;  %v1103_v49 = vld [vmem:[#allocation8 + $0xc0] ss:$8 sps:$4 sm:$0xff]   ;;  %v1104_v51 = vld [vmem:[#allocation8 + $0xb4] ss:$8 sps:$4 sm:$0xff]  }
  0x51   :  { %638 = vmatprep.subr.bf16.mxu0 %v1056_v19  ;;  %v1100_v50 = vld [vmem:[#allocation8 + $0x1e0] ss:$8 sps:$4 sm:$0xff]   ;;  %v1108_v52 = vld [vmem:[#allocation8 + $0x1d4] ss:$8 sps:$4 sm:$0xff]   ;;  %v1109_v53 = vld [vmem:[#allocation8 + $0xb0] ss:$8 sps:$4 sm:$0xff]  }
  0x52   :  { %674 = vmatpush1.bf16.msra.mxu1 %v1052_v18  ;;  %v1106_v54 = vld [vmem:[#allocation8 + $0x1d0] ss:$8 sps:$4 sm:$0xff]   ;;  %v1110_v55 = vld [vmem:[#allocation8 + $0xa4] ss:$8 sps:$4 sm:$0xff]   ;;  %v1115_v57 = vld [vmem:[#allocation8 + $0xa0] ss:$8 sps:$4 sm:$0xff]  }
  0x53   :  { %675 = vmatprep.subr.bf16.mxu1 %v1060_v20  ;;  %v1114_v56 = vld [vmem:[#allocation8 + $0x1c4] ss:$8 sps:$4 sm:$0xff]   ;;  %v1112_v58 = vld [vmem:[#allocation8 + $0x1c0] ss:$8 sps:$4 sm:$0xff]   ;;  %v1116_v59 = vld [vmem:[#allocation8 + $0x94] ss:$8 sps:$4 sm:$0xff]  }
  0x54   :  { %639 = vmatpush1.bf16.msra.mxu0 %v1061_v22  ;;  %v1120_v60 = vld [vmem:[#allocation8 + $0x1b4] ss:$8 sps:$4 sm:$0xff]   ;;  %v1118_v61 = vld [vmem:[#allocation8 + $0x1b0] ss:$8 sps:$4 sm:$0xff]   ;;  %v1122_v63 = vld [vmem:[#allocation8 + $0x84] ss:$8 sps:$4 sm:$0xff]  }
  0x55   :  { %640 = vmatprep.subr.bf16.mxu0 %v1062_v23  ;;  %v1121_v62 = vld [vmem:[#allocation8 + $0x90] ss:$8 sps:$4 sm:$0xff]   ;;  %v1126_v0 = vld [vmem:[#allocation8 + $0x1a4] ss:$8 sps:$4 sm:$0xff]   ;;  %v1124_v1 = vld [vmem:[#allocation8 + $0x1a0] ss:$8 sps:$4 sm:$0xff]  }
  0x56   :  { %676 = vmatpush1.bf16.msra.mxu1 %v1058_v21  ;;  %v1127_v2 = vld [vmem:[#allocation8 + $0x80] ss:$8 sps:$4 sm:$0xff]   ;;  %v1130_v3 = vld [vmem:[#allocation8 + $0x194] ss:$8 sps:$4 sm:$0xff]   ;;  %v1128_v4 = vld [vmem:[#allocation8 + $0x190] ss:$8 sps:$4 sm:$0xff]  }
  0x57   :  { %677 = vmatprep.subr.bf16.mxu1 %v1066_v24  ;;  %v1133_v5 = vld [vmem:[#allocation8 + $0x184] ss:$8 sps:$4 sm:$0xff]   ;;  %v1131_v6 = vld [vmem:[#allocation8 + $0x180] ss:$8 sps:$4 sm:$0xff]   ;;  %v1134_v7 = vld [vmem:[#allocation10 + $0x78] sm:$0xff]   ;;  %v1350_v9 = vshrl.u32 %v100_v8, 7 }
  0x58   :  { %641 = vmatpush1.bf16.msra.mxu0 %v1067_v25  ;;  %v98_v11 = vld [vmem:[#allocation7] sm:$0xf]  ;;  %s899_s8 = sshll.u32 %s1292_s30, 4  ;;  %s900_s8 = int_to_ptr.vmem [resolvable:$true] %s899_s8 }
  0x59   :  { %642 = vmatprep.subr.bf16.mxu0 %v1068_v27  ;;  %v102_v10 = vsub.s32 0, %v1350_v9  ;;  %v106_v12 = vsub.s32 1, %v1350_v9  ;;  %v110_v17 = vsub.s32 2, %v1350_v9  ;;  %v114_v20 = vsub.s32 3, %v1350_v9  ;;  %v980_v9 = vld [vmem:[%s1379_s6] ss:$0 sm:$0xff]  ;;  %p1257_p12 = scmp.lt.s32.totalorder %s900_s8, %s900_s8 }
  0x5a   :  { %678 = vmatpush1.bf16.msra.mxu1 %v1064_v26  ;;  %s1252_s9 = scalar_lea.vmem %s900_s8, 128 }
  0x5b   :  { %679 = vmatprep.subr.bf16.mxu1 %v1072_v28  ;;  %v103_v13 = vrot.slane %v98_v11, %v102_v10  ;;  %v107_v14 = vrot.slane %v98_v11, %v106_v12  ;;  %v111_v23 = vrot.slane %v98_v11, %v110_v17  ;;  %v115_v27 = vrot.slane %v98_v11, %v114_v20  ;;  %v1135_v28 = vld [vmem:[#allocation10 + $0x38] sm:$0xff]   ;;  %p1253_p11 = scmp.ne.s32.totalorder %s900_s8, %s1252_s9  ;;  %p1258_p13 = scmp.lt.s32.totalorder %s1252_s9, %s1252_s9 }
  0x5c   :  { %643 = vmatpush1.bf16.msra.mxu0 %v1073_v30 }
  0x5d   :  { %644 = vmatprep.subr.bf16.mxu0 %v1074_v31  ;;  %v1136_v31 = vld [vmem:[#allocation10 + $0x70] sm:$0xff]   ;;  %p1259_p0 = por %p1258_p13, %p1257_p12 }
  0x5e   :  { %680 = vmatpush1.bf16.msra.mxu1 %v1070_v29 }
  0x5f   :  { %681 = vmatprep.subr.bf16.mxu1 %v1078_v32  ;;  %p1260_p1 = pnand %p1259_p0, %p1253_p11 }
  0x60   :  { %645 = vmatpush1.bf16.msra.mxu0 %v1079_v33 }
  0x61   :  { %646 = vmatprep.subr.bf16.mxu0 %v1080_v35  ;;  %v1137_v35 = vld [vmem:[#allocation10 + $0x30] sm:$0xff]  }
  0x62   :  { %682 = vmatpush1.bf16.msra.mxu1 %v1076_v34 }
  0x63   :  { %683 = vmatprep.subr.bf16.mxu1 %v1084_v36 }
  0x64   :  { %647 = vmatpush2.bf16.msra.mxu0 %v1085_v38  ;;  %v1138_v38 = vld [vmem:[#allocation10 + $0x68] sm:$0xff]  }
  0x65   :  { %648 = vmatprep.subr.bf16.mxu0 %v1086_v39 }
  0x66   :  { %684 = vmatpush1.bf16.msra.mxu1 %v1082_v37 }
  0x67   :  { %685 = vmatprep.subr.bf16.mxu1 %v1090_v40 }
  0x68   :  { %649 = vmatpush2.bf16.msra.mxu0 %v1091_v42  ;;  %v1139_v42 = vld [vmem:[#allocation10 + $0x28] sm:$0xff]  }
  0x69   :  { %650 = vmatprep.subr.bf16.mxu0 %v1092_v43 }
  0x6a   :  { %686 = vmatpush1.bf16.msra.mxu1 %v1088_v41 }
  0x6b   :  { %687 = vmatprep.subr.bf16.mxu1 %v1096_v44  ;;  %v1140_v44 = vld [vmem:[#allocation10 + $0x60] sm:$0xff]  }
  0x6c   :  { %651 = vmatpush2.bf16.msra.mxu0 %v1097_v45  ;;  %v1141_v45 = vld [vmem:[#allocation10 + $0x20] sm:$0xff]  }
  0x6d   :  { %652 = vmatprep.subr.bf16.mxu0 %v1098_v47  ;;  %v1143_v47 = vld [vmem:[#allocation10 + $0x18] sm:$0xff]  }
  0x6e   :  { %688 = vmatpush2.bf16.msra.mxu1 %v1094_v46  ;;  %v1142_v46 = vld [vmem:[#allocation10 + $0x58] sm:$0xff]  }
  0x6f   :  { %689 = vmatprep.subr.bf16.mxu1 %v1102_v48  ;;  %v1144_v48 = vld [vmem:[#allocation10 + $0x50] sm:$0xff]  }
  0x70   :  { %653 = vmatpush2.bf16.msra.mxu0 %v1103_v49  ;;  %v1145_v49 = vld [vmem:[#allocation10 + $0x10] sm:$0xff]  }
  0x71   :  { %654 = vmatprep.subr.bf16.mxu0 %v1104_v51  ;;  %v1147_v51 = vld [vmem:[#allocation10 + $0x8] sm:$0xff]  }
  0x72   :  { %690 = vmatpush2.bf16.msra.mxu1 %v1100_v50  ;;  %v1146_v50 = vld [vmem:[#allocation10 + $0x48] sm:$0xff]  }
  0x73   :  { %691 = vmatprep.subr.bf16.mxu1 %v1108_v52  ;;  %v1148_v52 = vld [vmem:[#allocation10 + $0x40] sm:$0xff]  }
  0x74   :  { %655 = vmatpush2.bf16.msra.mxu0 %v1109_v53  ;;  %v1149_v53 = vld [vmem:[#allocation10] sm:$0xff]  }
  0x75   :  { %656 = vmatprep.subr.bf16.mxu0 %v1110_v55 }
  0x76   :  { %692 = vmatpush2.bf16.msra.mxu1 %v1106_v54  ;;  %v298_v54 = vld [vmem:[%s1377_s4] sm:$0x3] }
  0x77   :  { %693 = vmatprep.subr.bf16.mxu1 %v1114_v56 }
  0x78   :  { %657 = vmatpush2.bf16.msra.mxu0 %v1115_v57  ;;  %v303_v57 = vrot.slane %v298_v54, %v102_v10 }
  0x79   :  { %658 = vmatprep.subr.bf16.mxu0 %v1116_v59  ;;  %v307_v59 = vrot.slane %v298_v54, %v106_v12 }
  0x7a   :  { %694 = vmatpush2.bf16.msra.mxu1 %v1112_v58 }
  0x7b   :  { %695 = vmatprep.subr.bf16.mxu1 %v1120_v60 }
  0x7c   :  { %659 = vmatpush2.bf16.msra.mxu0 %v1121_v62 }
  0x7d   :  { %660 = vmatprep.subr.bf16.mxu0 %v1122_v63 }
  0x7e   :  { %696 = vmatpush2.bf16.msra.mxu1 %v1118_v61 }
  0x7f   :  { %697 = vmatprep.subr.bf16.mxu1 %v1126_v0 }
  0x80   :  { %661 = vmatpush2.bf16.msra.mxu0 %v1127_v2 }
  0x81   :  { %997 = vmatprep.subr.bf16.mxu0 %v1134_v7 }
  0x82   :  { %698 = vmatpush2.bf16.msra.mxu1 %v1124_v1 }
  0x83   :  { %699 = vmatprep.subr.bf16.mxu1 %v1130_v3 }
  0x86   :  { %700 = vmatpush2.bf16.msra.mxu1 %v1128_v4 }
  0x87   :  { %701 = vmatprep.subr.bf16.mxu1 %v1133_v5 }
  0x8a   :  { %702 = vmatpush2.bf16.msra.mxu1 %v1131_v6 }
 0x105   :  { %v178_v15 = vpop.f32.mrf.mxu1 }
 0x106   :  { %v179_v16 = vadd.f32 %v178_v15, %v103_v13 }
 0x107   :  { %v180_v18 = vpop.f32.mrf.mxu1 }
 0x108   :  { %v181_v19 = vadd.f32 %v180_v18, %v107_v14  ;;  %v226_v21 = vmax.f32 %v179_v16, 0.0 }
 0x109   :  { %v182_v22 = vpop.f32.mrf.mxu1 }
 0x10a   :  { %v227_v24 = vmax.f32 %v181_v19, 0.0  ;;  %v230_v29 = vpack.c.bf16 %v226_v21, %v226_v21 }
 0x10b   :  { %v183_v25 = vpop.f32.mrf.mxu1 }
 0x10c   :  { %v231_v26 = vpack.c.bf16 %v227_v24, %v227_v24 }
 0x10d   :  { %v219_v30 = vpop.f32.mrf.mxu1 }
 0x10e   :  { %v220_v32 = vadd.f32 %v219_v30, %v111_v23  ;;  %662 = vmatprep.mubr.bf16.mxu0 %v231_v26 }
 0x10f   :  { %v221_v33 = vpop.f32.mrf.mxu1  ;;  %663 = vmatmul.mubr.bf16.vlgmr.msra.gmra.mxu0 %v230_v29 }
 0x110   :  { %v222_v34 = vadd.f32 %v221_v33, %v115_v27  ;;  %998 = vmatpush3.bf16.msra.mxu0 %v1135_v28  ;;  %v228_v36 = vmax.f32 %v220_v32, 0.0 }
 0x111   :  { %v223_v37 = vpop.f32.mrf.mxu1  ;;  %999 = vmatprep.subr.bf16.mxu0 %v1136_v31 }
 0x112   :  { %v229_v39 = vmax.f32 %v222_v34, 0.0  ;;  %v232_v43 = vpack.c.bf16 %v228_v36, %v228_v36 }
 0x113   :  { %v224_v40 = vpop.f32.mrf.mxu1 }
 0x114   :  { %v233_v41 = vpack.c.bf16 %v229_v39, %v229_v39  ;;  %1000 = vmatpush3.bf16.msra.mxu0 %v1137_v35 }
 0x115   :  { %1001 = vmatprep.subr.bf16.mxu0 %v1138_v38 }
 0x116   :  { %703 = vmatprep.mubr.bf16.mxu1 %v233_v41 }
 0x117   :  { %704 = vmatmul.mubr.bf16.vlgmr.msra.gmra.mxu1 %v232_v43 }
 0x118   :  { %1002 = vmatpush3.bf16.msra.mxu0 %v1139_v42 }
 0x119   :  { %1003 = vmatprep.subr.bf16.mxu0 %v1140_v44 }
 0x11c   :  { %1004 = vmatpush3.bf16.msra.mxu0 %v1141_v45 }
 0x11d   :  { %1005 = vmatprep.subr.bf16.mxu0 %v1142_v46 }
 0x120   :  { %1006 = vmatpush3.bf16.msra.mxu0 %v1143_v47 }
 0x121   :  { %1007 = vmatprep.subr.bf16.mxu0 %v1144_v48 }
 0x124   :  { %1008 = vmatpush3.bf16.msra.mxu0 %v1145_v49 }
 0x125   :  { %1009 = vmatprep.subr.bf16.mxu0 %v1146_v50 }
 0x128   :  { %1010 = vmatpush3.bf16.msra.mxu0 %v1147_v51 }
 0x129   :  { %1011 = vmatprep.subr.bf16.mxu0 %v1148_v52 }
 0x12c   :  { %1012 = vmatpush3.bf16.msra.mxu0 %v1149_v53 }
 0x1cf   :  { %v664_v55 = vpop.f32.mrf.mxu0 }
 0x1d0   :  { %v665_v61 = vadd.f32 %v664_v55, %v303_v57 }
 0x1d1   :  { %v666_v56 = vpop.f32.mrf.mxu0 }
 0x1d2   :  { %v667_v63 = vadd.f32 %v666_v56, %v307_v59 }
 0x1d3   :  { %v668_v58 = vpop.f32.mrf.mxu0 }
 0x1d5   :  { %v669_v60 = vpop.f32.mrf.mxu0 }
 0x1d7   :  { %v705_v62 = vpop.f32.mrf.mxu1 }
 0x1d8   :  { %v706_v0 = vadd.f32 %v705_v62, %v665_v61 }
 0x1d9   :  { %v707_v1 = vpop.f32.mrf.mxu1 }
 0x1da   :  { %v708_v2 = vadd.f32 %v707_v1, %v667_v63  ;;  %v712_v3 = vmax.f32 %v706_v0, 0.0 }
 0x1db   :  { %v709_v4 = vpop.f32.mrf.mxu1 }
 0x1dc   :  { %v713_v5 = vmax.f32 %v708_v2, 0.0  ;;  %v714_v8 = vpack.c.bf16 %v712_v3, %v712_v3 }
 0x1dd   :  { %v710_v6 = vpop.f32.mrf.mxu1 }
 0x1de   :  { %v715_v7 = vpack.c.bf16 %v713_v5, %v713_v5 }
 0x1e0   :  { %883 = vmatprep.mubr.bf16.mxu0 %v715_v7 }
 0x1e1   :  { %884 = vmatmul.mubr.bf16.vlgmr.msra.gmra.mxu0 %v714_v8 }
 0x2a1   :  { %v1013_v10 = vpop.f32.mrf.mxu0 }
 0x2a3   :  { %v1014_v11 = vpop.f32.mrf.mxu0 }
 0x2a4   :  { %v1015_v12 = vadd.f32 %v1014_v11, %v1013_v10 }
 0x2a5   :  { %v1016_v13 = vpop.f32.mrf.mxu0 }
 0x2a6   :  { %v886_v14 = vadd.f32 %v1015_v12, %v980_v9 }
 0x2a7   :  { %v1017_v15 = vpop.f32.mrf.mxu0 }
 0x2a8   :  { %1150 = vtanh.f32 %v886_v14 }
 0x2b5   :  { %v1151_v16 = vpop.eup %1150 }
 0x2b6   :  { %892 = vst [vmem:[#allocation11] sm:$0xff] %v1151_v16 }
 0x2b7   :  { %1263 = shalt.err (!%p1260_p1)
}
 0x2b8   :  { %902 = dma.vmem_to_hbm [thread:$0]  %s900_s8, 128, %s1380_s7, [#allocation4]  }
 0x2b9   :  { %1278 = dma.done.wait [#allocation4], 128  }
 0x2ba   :  { %1279 = vsyncadd [#allocation4], 4294967168 }
 0x2bb   :  { %906 = vsyncpa [#allocation3], 1 }
 0x2bc   :  { %907 = vsyncpa [#allocation6], 1 }
 0x2bd   :  { %908 = vsyncpa [#allocation9], 1 }
 0x2be   :  { %909 = vsyncpa [#allocation4], 1 }

</bundles_post_ra>
